<compile_context>
chip_gen: v7x
topology: tpu7x:2x2x1
jax: 0.10.0
libtpu: 0.0.40
codegen_flags: <defaults>
</compile_context>

<pallas_src>
import functools

import jax
import jax.numpy as jnp
from jax.experimental import pallas as pl
from jax.experimental.pallas import tpu as pltpu


def _ce_kernel(logits1_ref, logits2_ref, target_ref, out_ref, *,
               n_rows: int, tn: int, blocks_per_split: int,
               needs_mask: bool, low_precision_exp: bool):
    """Accumulates sum over rows of (lse1 - tgt1) + (lse2 - tgt2) into out_ref."""
    p = pl.program_id(0)          # parallel split (TensorCore) index
    k = pl.program_id(1)          # reduction step within the split

    @pl.when(k == 0)
    def _init():
        out_ref[...] = jnp.zeros_like(out_ref)

    C = logits1_ref.shape[-1]
    x1 = logits1_ref[...]
    x2 = logits2_ref[...]

    def lse(x):
        if low_precision_exp:
            # bf16 max / sub / exp on the VPU & bf16 EUP (v6e/v7x); accumulate
            # sum / log in f32 for stability.
            m = jnp.max(x, axis=-1, keepdims=True)
            e = jnp.exp(x - m).astype(jnp.float32)
            s = jnp.sum(e, axis=-1, keepdims=True)
            return m.astype(jnp.float32) + jnp.log(s)
        xf = x.astype(jnp.float32)
        m = jnp.max(xf, axis=-1, keepdims=True)
        s = jnp.sum(jnp.exp(xf - m), axis=-1, keepdims=True)
        return m + jnp.log(s)

    lse12 = lse(x1) + lse(x2)                                   # (tn, 1) f32

    # Fused one-hot gather of BOTH heads' target logits:
    # one compare/select (VPU) + one lane reduce (XLU) instead of two of each.
    t = target_ref[...]                                         # (tn, 1) int32
    col = jax.lax.broadcasted_iota(jnp.int32, (tn, C), 1)
    x12 = x1.astype(jnp.float32) + x2.astype(jnp.float32)
    tgt12 = jnp.sum(jnp.where(col == t, x12, 0.0), axis=-1, keepdims=True)

    per_row = lse12 - tgt12                                     # (tn, 1)

    if needs_mask:  # static: only emitted when the blocks do not tile N exactly
        blk = p * blocks_per_split + k
        row = jax.lax.broadcasted_iota(jnp.int32, (tn, 1), 0) + blk * tn
        per_row = jnp.where(row < n_rows, per_row, 0.0)

    # (1,1) block sum broadcast-added into the resident (1,8,128) accumulator.
    out_ref[...] += jnp.sum(per_row, axis=0, keepdims=True)


def _vmem_capacity_bytes():
    try:
        return int(pltpu.get_tpu_info().vmem_capacity_bytes)
    except Exception:
        return 64 << 20        # conservative fallback (v7x per-TensorCore VMEM)


def _use_low_precision_exp(dtype):
    """bf16/f16 exp path only where the VPU/EUP have native 16-bit support."""
    dt = jnp.dtype(dtype)
    if dt.itemsize != 2 or not jnp.issubdtype(dt, jnp.floating):
        return False
    try:
        kind = jax.devices()[0].device_kind.lower()
    except Exception:
        return False
    return ("v6" in kind) or ("v7" in kind)   # v5e/v5p have no bf16 VPU/EUP


def _pick_rows_per_block(n, c, itemsize, sublane, budget_bytes):
    """Largest batch tile keeping 2 logits inputs x double-buffering + the
    lane-padded (tn,1) target buffers inside the per-generation VMEM budget."""
    per_row_bytes = 4 * c * itemsize + 2 * 128 * 4   # 2 inputs x2 bufs + target x2
    tn = budget_bytes // per_row_bytes
    tn = min(n, tn, 4096)                            # amortize ~0.35us/grid-step
    if tn < n:
        tn = (tn // sublane) * sublane               # dtype sublane multiple
    if tn < min(n, sublane):
        # TODO(synk): class-axis tiling (online LSE) for huge-C vocabularies.
        raise ValueError(
            f"class dim C={c} too large for VMEM budget {budget_bytes} bytes; "
            "class-axis tiling is not implemented")
    return tn


def loss_forward(output, target, ranking_logits, ranking_target,
                 *, margin: float = 1.0, A: float = 1.0, M: float = 1.0,
                 block_rows: int | None = None):
    logits1, logits2 = output
    assert logits1.shape == logits2.shape and logits1.dtype == logits2.dtype
    N, C = logits1.shape

    itemsize = jnp.dtype(logits1.dtype).itemsize
    sublane = max(8, 32 // itemsize)          # 8 f32, 16 bf16/f16, 32 int8/fp8

    capacity = _vmem_capacity_bytes()
    budget = (capacity * 3) // 8              # ~48 MiB on v5e/v6e, ~24 MiB on v7x

    if block_rows is None:
        tn = _pick_rows_per_block(N, C, itemsize, sublane, budget)
    else:
        tn = int(block_rows)
        assert tn == N or (0 < tn <= N and tn % sublane == 0), (
            f"block_rows must be N or a positive multiple of {sublane} for "
            f"dtype {logits1.dtype}")

    nb = pl.cdiv(N, tn)                       # number of real row blocks
    P = 2 if nb >= 2 else 1                   # TensorCore split (2x on v7x)
    K = pl.cdiv(nb, P)                        # reduction steps per split
    needs_mask = (P * K * tn != N)            # partial and/or ghost blocks

    if P * K == nb:
        row_idx = lambda p, k: (p * K + k, 0)
    else:                                     # odd block count: clamp the ghost
        row_idx = lambda p, k: (jnp.minimum(p * K + k, nb - 1), 0)

    target2d = target.reshape(N, 1).astype(jnp.int32)

    kernel = functools.partial(
        _ce_kernel, n_rows=N, tn=tn, blocks_per_split=K,
        needs_mask=needs_mask,
        low_precision_exp=_use_low_precision_exp(logits1.dtype))

    # Explicit scoped-VMEM limit matching the tile picker's budget:
    # double-buffered logits + lane-padded target buffers + output slabs.
    vmem_used = 4 * tn * C * itemsize + 2 * tn * 128 * 4 + 4 * 8 * 128 * 4
    vmem_limit = int(min(max(vmem_used + (8 << 20), 32 << 20),
                         (capacity * 9) // 10))
    vmem_limit = int(max(vmem_limit, vmem_used + (1 << 20)))

    cost = pl.CostEstimate(
        flops=int(10 * N * C),
        transcendentals=int(2 * N * C),
        bytes_accessed=int(2 * N * C * itemsize + 4 * N + P * 8 * 128 * 4),
    )

    partials = pl.pallas_call(
        kernel,
        out_shape=jax.ShapeDtypeStruct((P, 8, 128), jnp.float32),
        grid_spec=pltpu.PrefetchScalarGridSpec(
            num_scalar_prefetch=0,
            grid=(P, K),
            in_specs=[
                pl.BlockSpec((tn, C), row_idx),          # logits1 tile
                pl.BlockSpec((tn, C), row_idx),          # logits2 tile
                pl.BlockSpec((tn, 1), row_idx),          # target tile
            ],
            out_specs=pl.BlockSpec((1, 8, 128), lambda p, k: (p, 0, 0)),
        ),
        compiler_params=pltpu.CompilerParams(
            dimension_semantics=("parallel", "arbitrary"),
            vmem_limit_bytes=vmem_limit),
        cost_estimate=cost,
    )(logits1, logits2, target2d)

    ce_sum = jnp.sum(partials[:, 0, 0]) * (1.0 / N)      # = ce1 + ce2 (means)

    # Margin-ranking term is O(NR) vs the O(N*C) logits stream -> plain XLA in
    # the wrapper (frees the previously resident (3, NR) VMEM buffer).
    rx1 = ranking_logits[0].astype(jnp.float32).reshape(-1)
    rx2 = ranking_logits[1].astype(jnp.float32).reshape(-1)
    ry = ranking_target.astype(jnp.float32).reshape(-1)
    rank = jnp.mean(jnp.maximum(0.0, -ry * (rx1 - rx2) + margin))

    loss = A * ce_sum + M * rank
    return loss, ce_sum, rank


def _reference(output, target, ranking_logits, ranking_target,
               margin=1.0, A=1.0, M=1.0):
    """Pure-JAX reference mirroring torch CrossEntropyLoss / MarginRankingLoss."""
    def ce(x, t):
        x = x.astype(jnp.float32)
        lse = jax.nn.logsumexp(x, axis=-1)
        tgt = jnp.take_along_axis(x, t[:, None], axis=-1)[:, 0]
        return jnp.mean(lse - tgt)

    ce1 = ce(output[0], target)
    ce2 = ce(output[1], target)
    x1 = ranking_logits[0].astype(jnp.float32)
    x2 = ranking_logits[1].astype(jnp.float32)
    y = ranking_target.astype(jnp.float32)
    rank = jnp.mean(jnp.maximum(0.0, -y * (x1 - x2) + margin))
    return A * (ce1 + ce2) + M * rank, ce1 + ce2, rank


if __name__ == "__main__":
    MARGIN, A, M = 1.0, 1.0, 1.0

    key = jax.random.PRNGKey(0)
    k1, k2, k3, k4, k5, k6, k7 = jax.random.split(key, 7)

    N, C = 64, 128                       # small; lane-dense class axis
    logits_a = jax.random.normal(k1, (N, C), dtype=jnp.float32)
    logits_b = jax.random.normal(k2, (N, C), dtype=jnp.float32)
    target = jax.random.randint(k3, (N,), 0, C, dtype=jnp.int32)
    rank_x1 = jax.random.normal(k4, (N,), dtype=jnp.float32)
    rank_x2 = jax.random.normal(k5, (N,), dtype=jnp.float32)
    rank_y = (2 * jax.random.randint(k6, (N,), 0, 2, dtype=jnp.int32) - 1
              ).astype(jnp.float32)      # labels in {-1, +1}

    # 1) f32, block_rows=8 -> 8 blocks, 2 parallel splits x 4 reduction steps.
    out = loss_forward((logits_a, logits_b), target, (rank_x1, rank_x2), rank_y,
                       margin=MARGIN, A=A, M=M, block_rows=8)
    out = jax.block_until_ready(out)
    ref = _reference((logits_a, logits_b), target, (rank_x1, rank_x2), rank_y,
                     margin=MARGIN, A=A, M=M)
    for got, want in zip(out, ref):
        assert jnp.allclose(got, want, rtol=1e-5, atol=1e-5), (got, want)

    # 2) auto-picked tile (per-generation VMEM budget, explicit vmem_limit).
    out_auto = loss_forward((logits_a, logits_b), target,
                            (rank_x1, rank_x2), rank_y,
                            margin=MARGIN, A=A, M=M)
    out_auto = jax.block_until_ready(out_auto)
    for got, want in zip(out_auto, ref):
        assert jnp.allclose(got, want, rtol=1e-5, atol=1e-5), (got, want)

    # 3) ragged batch: N=72, block_rows=16 -> 5 real blocks (odd), exercises
    #    the partial final block, the clamped ghost block and the row mask.
    N2 = 72
    logits_a2 = jax.random.normal(k1, (N2, C), dtype=jnp.float32)
    logits_b2 = jax.random.normal(k2, (N2, C), dtype=jnp.float32)
    target2 = jax.random.randint(k3, (N2,), 0, C, dtype=jnp.int32)
    r1b = jax.random.normal(k7, (N2,), dtype=jnp.float32)
    r2b = jax.random.normal(k5, (N2,), dtype=jnp.float32)
    ryb = (2 * jax.random.randint(k6, (N2,), 0, 2, dtype=jnp.int32) - 1
           ).astype(jnp.float32)
    out_rag = loss_forward((logits_a2, logits_b2), target2, (r1b, r2b), ryb,
                           margin=MARGIN, A=A, M=M, block_rows=16)
    out_rag = jax.block_until_ready(out_rag)
    ref_rag = _reference((logits_a2, logits_b2), target2, (r1b, r2b), ryb,
                         margin=MARGIN, A=A, M=M)
    for got, want in zip(out_rag, ref_rag):
        assert jnp.allclose(got, want, rtol=1e-5, atol=1e-5), (got, want)

    # 4) bf16 logits: native-dtype streaming; block_rows=16 (bf16 sublane
    #    multiple); bf16 exp path is auto-enabled on v6e/v7x only.
    out_bf16 = loss_forward((logits_a.astype(jnp.bfloat16),
                             logits_b.astype(jnp.bfloat16)),
                            target, (rank_x1, rank_x2), rank_y,
                            margin=MARGIN, A=A, M=M, block_rows=16)
    out_bf16 = jax.block_until_ready(out_bf16)
    ref_bf16 = _reference((logits_a.astype(jnp.bfloat16),
                           logits_b.astype(jnp.bfloat16)),
                          target, (rank_x1, rank_x2), rank_y,
                          margin=MARGIN, A=A, M=M)
    for got, want in zip(out_bf16, ref_bf16):
        assert jnp.allclose(got, want, rtol=2e-2, atol=2e-2), (got, want)

    print("KERNEL_OK")
</pallas_src>

<mosaic_0001>
module attributes {stable_mosaic.version = 11 : i64} {
  func.func @_ce_kernel(%arg0: i32, %arg1: i32, %arg2: memref<8x128xf32, #tpu.memory_space<vmem>>, %arg3: memref<8x128xf32, #tpu.memory_space<vmem>>, %arg4: memref<8x1xi32, #tpu.memory_space<vmem>>, %arg5: memref<1x8x128xf32, #tpu.memory_space<vmem>>) attributes {dimension_semantics = [#tpu.dimension_semantics<parallel>, #tpu.dimension_semantics<arbitrary>], iteration_bounds = array<i64: 2, 4>, scalar_prefetch = 0 : i64, scratch_operands = 0 : i64, tpu.core_type = #tpu.core_type<tc>, window_params = [{transform_indices = @transform_0, window_bounds = array<i64: 8, 128>}, {transform_indices = @transform_1, window_bounds = array<i64: 8, 128>}, {transform_indices = @transform_2, window_bounds = array<i64: 8, 1>}, {transform_indices = @transform_3, window_bounds = array<i64: 1, 8, 128>}]} {
    %c0_i32 = arith.constant 0 : i32
    %0 = arith.cmpi eq, %arg1, %c0_i32 : i32
    %1 = arith.extui %0 : i1 to i32
    %c0_i32_0 = arith.constant 0 : i32
    %2 = arith.cmpi ne, %1, %c0_i32_0 : i32
    scf.if %2 {
      %cst_18 = arith.constant 0.000000e+00 : f32
      %41 = vector.broadcast %cst_18 : f32 to vector<1x8x128xf32>
      %c0_19 = arith.constant 0 : index
      %c0_20 = arith.constant 0 : index
      %c0_21 = arith.constant 0 : index
      %42 = vector.load %arg5[%c0_19, %c0_20, %c0_21] : memref<1x8x128xf32, #tpu.memory_space<vmem>>, vector<1x8x128xf32>
      tpu.vector_store %arg5[%c0_19, %c0_20, %c0_21], %41 {strides = array<i32>} : memref<1x8x128xf32, #tpu.memory_space<vmem>>, vector<1x8x128xf32>,
    } else {
    }
    %c0 = arith.constant 0 : index
    %c0_1 = arith.constant 0 : index
    %3 = vector.load %arg2[%c0, %c0_1] : memref<8x128xf32, #tpu.memory_space<vmem>>, vector<8x128xf32>
    %c0_2 = arith.constant 0 : index
    %c0_3 = arith.constant 0 : index
    %4 = vector.load %arg3[%c0_2, %c0_3] : memref<8x128xf32, #tpu.memory_space<vmem>>, vector<8x128xf32>
    %cst = arith.constant dense<0xFF800000> : vector<8xf32>
    %5 = vector.multi_reduction <maximumf>, %3, %cst [1] : vector<8x128xf32> to vector<8xf32>
    %6 = vector.shape_cast %5 : vector<8xf32> to vector<8x1xf32>
    %7 = vector.broadcast %6 : vector<8x1xf32> to vector<8x128xf32>
    %8 = arith.subf %3, %7 : vector<8x128xf32>
    %9 = math.exp %8 : vector<8x128xf32>
    %cst_4 = arith.constant dense<0.000000e+00> : vector<8xf32>
    %10 = vector.multi_reduction <add>, %9, %cst_4 [1] : vector<8x128xf32> to vector<8xf32>
    %11 = vector.shape_cast %10 : vector<8xf32> to vector<8x1xf32>
    %12 = math.log %11 : vector<8x1xf32>
    %13 = arith.addf %6, %12 : vector<8x1xf32>
    %cst_5 = arith.constant dense<0xFF800000> : vector<8xf32>
    %14 = vector.multi_reduction <maximumf>, %4, %cst_5 [1] : vector<8x128xf32> to vector<8xf32>
    %15 = vector.shape_cast %14 : vector<8xf32> to vector<8x1xf32>
    %16 = vector.broadcast %15 : vector<8x1xf32> to vector<8x128xf32>
    %17 = arith.subf %4, %16 : vector<8x128xf32>
    %18 = math.exp %17 : vector<8x128xf32>
    %cst_6 = arith.constant dense<0.000000e+00> : vector<8xf32>
    %19 = vector.multi_reduction <add>, %18, %cst_6 [1] : vector<8x128xf32> to vector<8xf32>
    %20 = vector.shape_cast %19 : vector<8xf32> to vector<8x1xf32>
    %21 = math.log %20 : vector<8x1xf32>
    %22 = arith.addf %15, %21 : vector<8x1xf32>
    %23 = arith.addf %13, %22 : vector<8x1xf32>
    %c0_7 = arith.constant 0 : index
    %c0_8 = arith.constant 0 : index
    %24 = vector.load %arg4[%c0_7, %c0_8] : memref<8x1xi32, #tpu.memory_space<vmem>>, vector<8x1xi32>
    %25 = tpu.iota {dimensions = array<i32: 1>} : vector<8x128xi32>
    %26 = arith.addf %3, %4 : vector<8x128xf32>
    %27 = vector.broadcast %24 : vector<8x1xi32> to vector<8x128xi32>
    %28 = arith.cmpi eq, %25, %27 : vector<8x128xi32>
    %cst_9 = arith.constant 0.000000e+00 : f32
    %29 = vector.broadcast %cst_9 : f32 to vector<8x128xf32>
    %30 = arith.select %28, %26, %29 : vector<8x128xi1>, vector<8x128xf32>
    %cst_10 = arith.constant dense<0.000000e+00> : vector<8xf32>
    %31 = vector.multi_reduction <add>, %30, %cst_10 [1] : vector<8x128xf32> to vector<8xf32>
    %32 = vector.shape_cast %31 : vector<8xf32> to vector<8x1xf32>
    %33 = arith.subf %23, %32 : vector<8x1xf32>
    %c0_11 = arith.constant 0 : index
    %c0_12 = arith.constant 0 : index
    %c0_13 = arith.constant 0 : index
    %34 = vector.load %arg5[%c0_11, %c0_12, %c0_13] : memref<1x8x128xf32, #tpu.memory_space<vmem>>, vector<1x8x128xf32>
    %cst_14 = arith.constant dense<0.000000e+00> : vector<1xf32>
    %35 = vector.multi_reduction <add>, %33, %cst_14 [0] : vector<8x1xf32> to vector<1xf32>
    %36 = vector.shape_cast %35 : vector<1xf32> to vector<1x1xf32>
    %37 = vector.shape_cast %36 : vector<1x1xf32> to vector<1x1x1xf32>
    %38 = vector.broadcast %37 : vector<1x1x1xf32> to vector<1x8x128xf32>
    %39 = arith.addf %34, %38 : vector<1x8x128xf32>
    %c0_15 = arith.constant 0 : index
    %c0_16 = arith.constant 0 : index
    %c0_17 = arith.constant 0 : index
    %40 = vector.load %arg5[%c0_15, %c0_16, %c0_17] : memref<1x8x128xf32, #tpu.memory_space<vmem>>, vector<1x8x128xf32>
    tpu.vector_store %arg5[%c0_15, %c0_16, %c0_17], %39 {strides = array<i32>} : memref<1x8x128xf32, #tpu.memory_space<vmem>>, vector<1x8x128xf32>,
    return
  }
  func.func @transform_0(%arg0: i32, %arg1: i32) -> (i32, i32) {
    %c4_i32 = arith.constant 4 : i32
    %0 = arith.muli %arg0, %c4_i32 : i32
    %1 = arith.addi %0, %arg1 : i32
    %c0_i32 = arith.constant 0 : i32
    %c0_i32_0 = arith.constant 0 : i32
    return %1, %c0_i32 : i32, i32
  }
  func.func @transform_1(%arg0: i32, %arg1: i32) -> (i32, i32) {
    %c4_i32 = arith.constant 4 : i32
    %0 = arith.muli %arg0, %c4_i32 : i32
    %1 = arith.addi %0, %arg1 : i32
    %c0_i32 = arith.constant 0 : i32
    %c0_i32_0 = arith.constant 0 : i32
    return %1, %c0_i32 : i32, i32
  }
  func.func @transform_2(%arg0: i32, %arg1: i32) -> (i32, i32) {
    %c4_i32 = arith.constant 4 : i32
    %0 = arith.muli %arg0, %c4_i32 : i32
    %1 = arith.addi %0, %arg1 : i32
    %c0_i32 = arith.constant 0 : i32
    %c0_i32_0 = arith.constant 0 : i32
    return %1, %c0_i32 : i32, i32
  }
  func.func @transform_3(%arg0: i32, %arg1: i32) -> (i32, i32, i32) {
    %c0_i32 = arith.constant 0 : i32
    %c0_i32_0 = arith.constant 0 : i32
    %c0_i32_1 = arith.constant 0 : i32
    return %arg0, %c0_i32, %c0_i32_0 : i32, i32, i32
  }
}

</mosaic_0001>

<bundles_post_ra>
// kernel: tpu_custom_call.1
= control target key start
LH: loop header
LB: loop body
LE: loop exit
PB: predicated region body
PF: predicated region fallthrough
CT: control target
= control target key end

     0   :  { %s998_s0 = inlined_call_operand.vmem [shape: f32[64,128], index: 0, kind: input, shape index: {}]   ;;  %s999_s1 = inlined_call_operand.hbm [shape: f32[64,128], index: 1, kind: input, shape index: {}]   ;;  %s1000_s2 = inlined_call_operand.vmem [shape: s32[64,1], index: 2, kind: input, shape index: {}]   ;;  %s1001_s3 = inlined_call_operand.hbm [shape: f32[2,8,128], index: 3, kind: output, shape index: {}]  }
   0x1   :  { %1004 = sst [smem:[#allocation9_spill]] %s999_s1 }
   0x2   :  { %8 = vsyncpa [#allocation3], 0 }
   0x3   :  { %10 = vsyncpa [#allocation3 + $0x1], 0 }
   0x4   :  { %11 = vsyncpa [#allocation4], 0 }
   0x5   :  { %13 = vsyncpa [#allocation4 + $0x1], 0  ;;  %s755_s12 = smov 0   ;;  %s757_s13 = smov 0  }
   0x6   :  { %s759_s14 = smov 0   ;;  %s761_s15 = smov 0  }
   0x7   :  { %s763_s16 = smov 0   ;;  %s765_s17 = smov 0  }
   0x8   :  { %s767_s18 = smov 0   ;;  %s769_s19 = smov 0  }
   0x9   :  { %s771_s20 = smov 0   ;;  %s773_s21 = smov 0  }
   0xa   :  { %s775_s22 = smov 0  }
   0xb LB: > { %s438_s23 = sadd.s32 4294967295, %s729_s22   ;;  %s439_s24 = sadd.s32 4294967294, %s729_s22   ;;  %s729_s22 = sphi %s775_s22, %s19_s22   ;;  %s725_s21 = sphi %s773_s21, %s1026_s21   ;;  %s721_s20 = sphi %s771_s20, %s1025_s20   ;;  %s717_s19 = sphi %s769_s19, %s1024_s19   ;;  %s713_s18 = sphi %s767_s18, %s1023_s18   ;;  %s709_s17 = sphi %s765_s17, %s1022_s17   ;;  %s705_s16 = sphi %s763_s16, %s1021_s16   ;;  %s701_s15 = sphi %s761_s15, %s1020_s15   ;;  %s697_s14 = sphi %s759_s14, %s1019_s14   ;;  %s693_s13 = sphi %s757_s13, %s1018_s13   ;;  %s689_s12 = sphi %s755_s12, %s1017_s12  }
   0xc   : > { %s28_s25 = sadd.s32 1, %s721_s20  ;;  %s31_s26 = sadd.s32 1, %s725_s21 }
   0xd   : > { %p29_p0 = scmp.ge.s32.totalorder %s28_s25, 4  ;;  %s442_s27 = sshll.u32 %s725_s21, 2 }
   0xe   : > { %s814_s28 = sadd.s32 %s721_s20, %s442_s27  ;;  %s72_s29 = sadd.s32 1, %s709_s17 }
   0xf   : > { %s1028_s25 = smov (%p29_p0, %s28_s25), 0  ;;  %s1030_s26 = smov (!%p29_p0, %s31_s26), %s725_s21 }
  0x10   : > { %p79_p1 = scmp.ne.s32.totalorder %s709_s17, %s705_s16  ;;  %p80_p2 = scmp.eq.s32.totalorder %s729_s22, 0 }
  0x11   : > { %p33_p3 = scmp.ge.s32.totalorder %s1030_s26, 2  ;;  %p85_p4 = scmp.ne.s32.totalorder %s705_s16, %s701_s15 }
  0x12   : > { %p824_p5 = por %p80_p2, %p79_p1  ;;  %p86_p6 = scmp.eq.s32.totalorder %s438_s23, 0 }
  0x13   : > { %s1032_s26 = smov (%p33_p3, %s1030_s26), 0  ;;  %s128_s5 = sadd.s32 1, %s697_s14 }
  0x14   : > { %1006 = sst [smem:[#allocation8_spill]] %s1032_s26  ;;  %p830_p7 = por %p86_p6, %p85_p4 }
  0x15   : > { %s443_s6 = sshll.u32 %s1032_s26, 2  ;;  %s125_s7 = ssub.s32 %s725_s21, %s1032_s26 }
  0x16   : > { %s68_s8 = sadd.s32 %s443_s6, %s1028_s25  ;;  %p126_p8 = scmp.eq.s32.totalorder %s125_s7, 0 }
  0x17   : > { %s69_s9 = ssub.s32 %s814_s28, %s68_s8  ;;  %p138_p9 = scmp.ne.s32.totalorder %s697_s14, %s693_s13 }
  0x18   : > { %p70_p10 = scmp.eq.s32.totalorder %s69_s9, 0  ;;  %p139_p11 = scmp.eq.s32.totalorder %s438_s23, 7 }
  0x19   : > { %s843_s10 = scalar_select %p126_p8, %s697_s14, %s128_s5  }
  0x1a   : > { %s846_s11 = scalar_select %p70_p10, %s709_s17, %s72_s29  }
  0x1b   : > { %p848_p12 = por %p139_p11, %p138_p9  ;;  %p144_p13 = scmp.ne.s32.totalorder %s693_s13, %s689_s12 }
  0x1c   : > { %p145_p0 = scmp.eq.s32.totalorder %s439_s24, 7  ;;  %p475_p1 = scmp.lt.s32.totalorder %s729_s22, 8 }
  0x1d   : > { %s1008_s15 = scalar_select %p848_p12, 1, 0 }
  0x1e   : > { %s176_s27 = sand.u32 1, %s709_s17   ;;  %p858_p2 = por %p145_p0, %p144_p13 }
  0x1f   : > { %s448_s23 = sshll.u32 %s176_s27, 3  ;;  %s450_s7 = sshll.u32 %s814_s28, 7 }
  0x20   : > { %s1009_s6 = scalar_select %p858_p2, 1, 0 }
  0x21   : > { %s1010_s1 = sld [smem:[#allocation9_spill]]  ;;  %s180_s9 = scalar_lea.vmem [#allocation2], %s448_s23 }
  0x22   : > { %s189_s26 = sshll.u32 %s180_s9, 4  ;;  %p870_p3 = pnand %p475_p1, %p824_p5  ;;  %s874_s26 = int_to_ptr.vmem [resolvable:$true] %s189_s26 }
  0x23   : > { %s177_s28 = scalar_lea.sflag [#allocation3], %s176_s27 }
  0x24   : > { %p579_p9 = pneg %p870_p3 }
  0x27   : > { %s866_s29 = scalar_lea.hbm %s1010_s1, %s450_s7  ;;  %s582_s5 = scalar_lea.hbm %s1010_s1, 1024 }
  0x28   : > { %s577_s7 = scalar_lea.hbm %s866_s29, 128  ;;  %p583_p5 = scmp.lt.u32.totalorder %s866_s29, %s1010_s1 }
  0x29   : > { %p578_p8 = scmp.ne.s32.totalorder %s866_s29, %s577_s7  ;;  %p584_p13 = scmp.lt.u32.totalorder %s582_s5, %s577_s7 }
  0x2a   : > { %p586_p1 = scmp.lt.u32.totalorder %s577_s7, %s866_s29 }
  0x2b   : > { %p580_p10 = pnand %p579_p9, %p578_p8  ;;  %p585_p0 = por %p584_p13, %p583_p5 }
  0x2d   : > { %p581_p11 = pneg %p580_p10  ;;  %p587_p4 = por %p586_p1, %p585_p0 }
  0x2f   : > { %p588_p6 = pnand %p587_p4, %p581_p11 }
  0x31   : > { %591 = shalt.err (!%p588_p6)
}
  0x32   : > { %s592_s27 = scalar_lea.vmem %s874_s26, 128  ;;  %s731_s30 = smov [#allocation2]  }
  0x33   : > { %p593_p8 = scmp.ne.s32.totalorder %s874_s26, %s592_s27  ;;  %s597_s23 = sshll.u32 %s731_s30, 4  ;;  %s598_s23 = int_to_ptr.vmem [resolvable:$false] %s597_s23 }
  0x34   : > { %s599_s8 = scalar_lea.vmem %s598_s23, 256  ;;  %p600_p12 = scmp.lt.s32.totalorder %s874_s26, %s598_s23 }
  0x35   : > { %p595_p10 = pnand %p593_p8, %p579_p9  ;;  %p601_p5 = scmp.lt.s32.totalorder %s599_s8, %s592_s27 }
  0x37   : > { %p596_p2 = pneg %p595_p10  ;;  %p602_p13 = por %p601_p5, %p600_p12 }
  0x39   : > { %p603_p0 = pnand %p602_p13, %p596_p2 }
  0x3b   : > { %606 = shalt.err (!%p603_p0)
}
  0x3c   : > { %470 = dma.hbm_to_vmem [thread:$0]  (!%p870_p3), %s866_s29, 128, %s874_s26, %s177_s28  }
  0x3d   : > { %p1012_p4 = scmp.lt.s32.totalorder %s729_s22, 9  ;;  %p1013_p6 = scmp.ge.s32.totalorder %s729_s22, 1 }
  0x3f   : > { %p206_p9 = pnand %p1013_p6, %p1012_p4 }
  0x40   : > { %s211_s7 = sand.u32 (!%p206_p9), 1, %s705_s16  }
  0x41   : > { %209 = sbr.rel (%p206_p9) target bundleno = 436 (0x1b4), region = 32  ;;  %s452_s5 = sshll.u32 (!%p206_p9), %s211_s7, 3 }
  0x42   : > { %s212_s9 = scalar_lea.sflag (!%p206_p9), [#allocation3], %s211_s7  ;;  %s215_s27 = scalar_lea.vmem (!%p206_p9), [#allocation2], %s452_s5 }
  0x48   : > { %680 = dma.done.wait (%p830_p7), %s212_s9, 128  }
  0x49   : > { %682 = vsyncadd (%p830_p7), %s212_s9, 4294967168  ;;  %s247_s26 = sand.u32 1, %s693_s13   ;;  %s454_s29 = sshll.u32 %s717_s19, 2 }
  0x4a   : > { %s453_s24 = sshll.u32 %s247_s26, 3  ;;  %s251_s28 = sadd.s32 %s713_s18, %s454_s29 }
  0x4b   : > { %p252_p12 = scmp.lt.s32.totalorder %s251_s28, 7  ;;  %s923_s9 = scalar_lea.vmem [#allocation5], %s453_s24 }
  0x4c   : > { %p458_p7 = scmp.ne.s32.totalorder %s713_s18, 0 }
  0x4d   : > { %s1034_s28 = smov (!%p252_p12, %s251_s28), 7  ;;  %v732_v0 = vmov (!%p458_p7), 0.0  }
  0x4e   : > { %s455_s30 = sshll.u32 %s1034_s28, 3  ;;  %271 = sbr.rel (%p458_p7) target bundleno = 85 (0x55), region = 40  ;;  %272 = vst [vmem:[%s923_s9] sm:$0xff] (!%p458_p7), %v732_v0 }
  0x4f   : > { %s255_s7 = scalar_lea.vmem %s998_s0, %s455_s30  ;;  %s265_s4 = scalar_lea.vmem %s1000_s2, %s455_s30 }
  0x55 PF: > { %v273_v1 = vld [vmem:[%s255_s7] sm:$0xff]  ;;  %v733_v3 = vmov 0   ;;  %v297_v11 = vlaneseq  ;;  %v308_v34 = vld [vmem:[%s923_s9] sm:$0xff]  ;;  %s460_s1 = sshll.u32 %s717_s19, 7  ;;  %s331_s18 = sshll.u32 %s923_s9, 4  ;;  %s935_s18 = int_to_ptr.vmem [resolvable:$true] %s331_s18 }
  0x56   : > { %v296_v2 = vld [vmem:[%s265_s4] sm:$0xff]  ;;  %275 = vmax.xlane.f32.xlu0 %v273_v1  ;;  %567 = vset.pattern.permute.xlu1 %v733_v3  ;;  %s933_s24 = scalar_lea.hbm %s1001_s3, %s460_s1  ;;  %s318_s28 = scalar_lea.sflag [#allocation4], %s247_s26 }
  0x57   : > { %v274_v4 = vld [vmem:[%s215_s27] sm:$0xff]  ;;  %301 = vperm.xlu1 %567, %v296_v2   ;;  %568 = vset.pattern.permute.xlu0 %v733_v3  ;;  %v298_v12 = vand.u32 127, %v297_v11  ;;  %s607_s30 = scalar_lea.vmem %s935_s18, 128  ;;  %p1014_p3 = scmp.ne.s32.totalorder %s1008_s15, 0 }
  0x58   : > { %v299_v15 = vadd.f32 %v274_v4, %v273_v1  ;;  %p608_p2 = scmp.ne.s32.totalorder %s935_s18, %s607_s30  ;;  %s734_s19 = smov [#allocation5]  }
  0x59   : > { %s611_s23 = sshll.u32 %s734_s19, 4  ;;  %s612_s23 = int_to_ptr.vmem [resolvable:$false] %s611_s23 }
  0x5a   : > { %285 = vmax.xlane.f32.xlu0 %v274_v4  ;;  %p609_p11 = pnand %p608_p2, %p1014_p3  ;;  %s613_s8 = scalar_lea.vmem %s612_s23, 256 }
  0x5b   : > { %p614_p8 = scmp.lt.s32.totalorder %s935_s18, %s612_s23  ;;  %p615_p10 = scmp.lt.s32.totalorder %s613_s8, %s607_s30 }
  0x5c   : > { %p610_p1 = pneg %p609_p11 }
  0x5d   : > { %p616_p5 = por %p615_p10, %p614_p8 }
  0x5f   : > { %p617_p13 = pnand %p616_p5, %p610_p1 }
  0xd6   : > { %v302_v14 = vpop.permute.xlu1 %301 }
  0xd7   : > { %vm303_vm0 = vcmp.eq.s32.totalorder %v298_v12, %v302_v14 }
  0xd8   : > { %v304_v17 = vsel %vm303_vm0, %v299_v15, 0.0 }
  0xe3   : > { %v276_v5 = vpop.xlane.xlu0 %275 }
  0xe4   : > { %v277_v6 = vsub.f32 %v273_v1, %v276_v5 }
  0xe6   : > { %v278_v7 = vmul.f32 1.442695, %v277_v6 }
  0xe7   : > { %v286_v8 = vpop.xlane.xlu0 %285 }
  0xe8   : > { %569 = vpow2.f32 %v278_v7  ;;  %v287_v9 = vsub.f32 %v274_v4, %v286_v8 }
  0xea   : > { %v288_v10 = vmul.f32 1.442695, %v287_v9 }
  0xec   : > { %571 = vpow2.f32 %v288_v10 }
  0xf2   : > { %v570_v13 = vpop.eup %569 }
  0xf3   : > { %280 = vadd.xlane.f32.xlu1 %v570_v13 }
  0xf6   : > { %v572_v16 = vpop.eup %571 }
  0xf7   : > { %290 = vadd.xlane.f32.xlu0 %v572_v16 }
  0xfb   : > { %305 = vadd.xlane.f32.xlu0 %v304_v17 }
 0x180   : > { %v281_v18 = vpop.xlane.xlu1 %280 }
 0x181   : > { %573 = vlog2.f32 %v281_v18 }
 0x184   : > { %v291_v19 = vpop.xlane.xlu0 %290 }
 0x185   : > { %575 = vlog2.f32 %v291_v19 }
 0x188   : > { %v306_v26 = vpop.xlane.xlu0 %305 }
 0x18b   : > { %v574_v20 = vpop.eup %573 }
 0x18c   : > { %v283_v21 = vmul.f32 0.6931472, %v574_v20 }
 0x18e   : > { %v284_v24 = vadd.f32 %v283_v21, %v276_v5 }
 0x18f   : > { %v576_v22 = vpop.eup %575 }
 0x190   : > { %v293_v23 = vmul.f32 0.6931472, %v576_v22 }
 0x192   : > { %v294_v25 = vadd.f32 %v293_v23, %v286_v8 }
 0x194   : > { %v295_v27 = vadd.f32 %v294_v25, %v284_v24 }
 0x196   : > { %v307_v28 = vsub.f32 %v295_v27, %v306_v26 }
 0x198   : > { %v309_v29 = vrot.slane %v307_v28, 4 }
 0x19a   : > { %v310_v30 = vadd.f32 %v309_v29, %v307_v28 }
 0x19c   : > { %v311_v31 = vrot.slane %v310_v30, 2 }
 0x19e   : > { %v312_v32 = vadd.f32 %v311_v31, %v310_v30 }
 0x1a0   : > { %v313_v33 = vrot.slane %v312_v32, 1 }
 0x1a2   : > { %v314_v35 = vadd.f32 %v313_v33, %v312_v32 }
 0x1a4   : > { %v315_v36 = vadd.f32 %v314_v35, %v308_v34 }
 0x1a6   : > { %316 = vst [vmem:[%s923_s9] sm:$0xff] %v315_v36 }
 0x1a7   : > { %620 = shalt.err (!%p617_p13)
}
 0x1a8   : > { %s621_s26 = scalar_lea.hbm %s933_s24, 128  ;;  %s625_s4 = scalar_lea.hbm %s1001_s3, 256 }
 0x1a9   : > { %p622_p0 = scmp.ne.s32.totalorder %s933_s24, %s621_s26  ;;  %p626_p9 = scmp.lt.u32.totalorder %s933_s24, %s1001_s3 }
 0x1aa   : > { %p627_p12 = scmp.lt.u32.totalorder %s625_s4, %s621_s26  ;;  %p629_p2 = scmp.lt.u32.totalorder %s621_s26, %s933_s24 }
 0x1ab   : > { %p623_p4 = pnand %p622_p0, %p1014_p3 }
 0x1ac   : > { %p628_p7 = por %p627_p12, %p626_p9 }
 0x1ad   : > { %p624_p6 = pneg %p623_p4 }
 0x1ae   : > { %p630_p11 = por %p629_p2, %p628_p7 }
 0x1b0   : > { %p631_p1 = pnand %p630_p11, %p624_p6 }
 0x1b2   : > { %634 = shalt.err (!%p631_p1)
}
 0x1b3   : > { %465 = dma.vmem_to_hbm [thread:$0]  (%p1014_p3), %s935_s18, 128, %s933_s24, %s318_s28  }
 0x1b4 PF: > { %p476_p8 = scmp.ge.s32.totalorder %s729_s22, 2  ;;  %s343_s27 = sand.u32 1, %s689_s12  }
 0x1b5   : > { %p1015_p10 = scmp.ne.s32.totalorder %s1009_s6, 0  ;;  %s344_s29 = scalar_lea.sflag [#allocation4], %s343_s27 }
 0x1b7   : > { %p472_p5 = pnand %p476_p8, %p1015_p10 }
 0x1b9   : > { %684 = dma.done.wait (!%p472_p5), %s344_s29, 128  }
 0x1ba   : > { %686 = vsyncadd (!%p472_p5), %s344_s29, 4294967168  ;;  %s19_s22 = sadd.s32 1, %s729_s22   ;;  %s1016_s24 = sld [smem:[#allocation8_spill]] }
 0x1bb   : > { %p16_p13 = scmp.ge.s32.totalorder %s19_s22, 10   ;;  %s1017_s12 = smov %s693_s13 }
 0x1bc   : > { %s1018_s13 = smov %s697_s14  ;;  %s1019_s14 = smov %s843_s10 }
 0x1bd   : > { %s1020_s15 = smov %s705_s16  ;;  %s1021_s16 = smov %s709_s17 }
 0x1be   : > { %s1022_s17 = smov %s846_s11  ;;  %s1023_s18 = smov %s721_s20 }
 0x1bf   : > { %s1024_s19 = smov %s725_s21  ;;  %s1025_s20 = smov %s1028_s25 }
 0x1c0   : > { %s1026_s21 = smov %s1016_s24  ;;  %18 = sbr.rel (!%p16_p13) target bundleno = 11 (0xb), region = 87 }
 0x1c7   :  { %349 = vsyncpa [#allocation3], 1 }
 0x1c8   :  { %351 = vsyncpa [#allocation3 + $0x1], 1 }
 0x1c9   :  { %352 = vsyncpa [#allocation4], 1 }
 0x1ca   :  { %354 = vsyncpa [#allocation4 + $0x1], 1 }

</bundles_post_ra>
